<compile_context>
chip_gen: v7x
topology: tpu7x:2x2x1
jax: 0.10.0
libtpu: 0.0.40
codegen_flags: <defaults>
</compile_context>

<pallas_src>
import functools

import numpy as np
import jax
import jax.numpy as jnp
from jax.experimental import pallas as pl
from jax.experimental.pallas import tpu as pltpu

_BN_EPS = 1e-5
_LANE = 128
_MAX_TILE = 4096


# ---------------------------------------------------------------------------
# Hardware-aware budgets
# ---------------------------------------------------------------------------
def _vmem_limit_bytes() -> int:
    """Generation-aware VMEM ceiling: ~48 MiB on v7x (64 MiB physical),
    ~96 MiB on v5e/v6e (128 MiB physical)."""
    try:
        cap = int(pltpu.get_tpu_info().vmem_capacity_bytes)
    except Exception:
        cap = 64 * 1024 * 1024            # conservative fallback (v7x physical)
    return min((cap * 3) // 4, 96 * 1024 * 1024)


def _pick_tile(hw: int, per_col_bytes: int, fixed_bytes: int,
               budget_bytes: int) -> int:
    """Largest multiple-of-128 pixel tile whose double-buffered blocks fit."""
    cols = max((budget_bytes - fixed_bytes) // max(per_col_bytes, 1), _LANE)
    t = (min(cols, _MAX_TILE) // _LANE) * _LANE
    t_hw = max((hw // _LANE) * _LANE, _LANE)   # no point exceeding H*W (rounded)
    return int(max(min(t, t_hw), _LANE))


def _choose_channel_block(c: int, n: int) -> int:
    """v7x megacore: when N == 1 the batch axis gives no parallelism; split the
    channel axis so the second TensorCore has work.  No-op on v5e/v6e."""
    if n >= 2 or c < 16:
        return c
    half = c // 2
    return half if (c % half == 0 and half % 8 == 0) else c


# ---------------------------------------------------------------------------
# Host-side construction of the static spatial operators (tiny, cached)
# ---------------------------------------------------------------------------
def _adaptive_pool_matrix(in_size: int, out_size: int) -> np.ndarray:
    """nn.AdaptiveAvgPool2d 1-D operator: row i averages [floor(i*I/O), ceil((i+1)*I/O))."""
    m = np.zeros((out_size, in_size), dtype=np.float32)
    for i in range(out_size):
        s = (i * in_size) // out_size
        e = -((-(i + 1) * in_size) // out_size)
        m[i, s:e] = 1.0 / float(e - s)
    return m


def _bilinear_matrix(out_size: int, in_size: int) -> np.ndarray:
    """F.interpolate(mode='bilinear', align_corners=False) 1-D operator."""
    m = np.zeros((out_size, in_size), dtype=np.float32)
    scale = in_size / out_size
    for o in range(out_size):
        src = max((o + 0.5) * scale - 0.5, 0.0)
        i0 = min(int(np.floor(src)), in_size - 1)
        i1 = min(i0 + 1, in_size - 1)
        lam = src - i0
        m[o, i0] += 1.0 - lam
        m[o, i1] += lam
    return m


def _level_layout(bins):
    """(offset, b*b) per level inside the concatenated sum_bb axis."""
    slices, off = [], 0
    for b in bins:
        slices.append((off, b * b))
        off += b * b
    return tuple(slices), off


@functools.lru_cache(maxsize=None)
def _build_operators(H: int, W: int, bins):
    """Per-sample spatial operators shared by every batch element.

    Returns:
      poolT: (H*W, sum_bb)  column block l = adaptive-avg-pool weights of bin l
      upT:   (sum_bb, H*W)  row block l    = bilinear upsample weights of bin l
    """
    pool_cols, up_rows = [], []
    for b in bins:
        ah = _adaptive_pool_matrix(H, b)
        aw = _adaptive_pool_matrix(W, b)
        pool_cols.append(
            np.einsum("ih,jw->ijhw", ah, aw).reshape(b * b, H * W).T)
        bh = _bilinear_matrix(H, b)
        bw = _bilinear_matrix(W, b)
        up_rows.append(
            np.einsum("hi,wj->ijhw", bh, bw).reshape(b * b, H * W))
    return np.concatenate(pool_cols, axis=1), np.concatenate(up_rows, axis=0)


# ---------------------------------------------------------------------------
# Kernels
# ---------------------------------------------------------------------------
def _make_pool_kernel(hw, tile, mask_remainder, compute_dtype):
    def pool_kernel(x_ref, poolT_ref, pooled_ref):
        """Adaptive average pooling for ALL bins, accumulated over pixel tiles.

        x_ref:      (1, Cb, T)       channel-block pixel tile (original dtype)
        poolT_ref:  (T, sum_bb)      pooling weights (zero-padded past H*W)
        pooled_ref: (1, Cb, sum_bb)  f32 accumulator, resident across tiles
        """
        @pl.when(pl.program_id(2) == 0)
        def _init():
            pooled_ref[...] = jnp.zeros_like(pooled_ref)

        xk = x_ref[0].astype(compute_dtype)
        if mask_remainder:
            # Last tile reads past H*W (garbage); zero those columns so the
            # contraction against the zero-padded poolT rows stays exact.
            col = jax.lax.broadcasted_iota(jnp.int32, xk.shape, 1)
            valid = hw - pl.program_id(2) * tile
            xk = jnp.where(col < valid, xk, jnp.zeros_like(xk))

        pooled_ref[0] = pooled_ref[0] + jnp.dot(
            xk, poolT_ref[...], preferred_element_type=jnp.float32)
    return pool_kernel


def _head_kernel(pooled_ref, w_ref, m_ref, invc_ref, qn_ref, ssum_ref, ssq_ref):
    """1x1 conv (no bias) + BatchNorm2d(affine=False, train-mode batch stats,
    eps=1e-5) + ReLU on the pooled features of every level, two-phase:
      phase 0: accumulate per-channel sum / sum-of-squares over the batch
      phase 1: recompute the (cheap) conv and emit the normalized features as a
               block-structured (L*R, sum_bb) tensor (zeros off the diagonal),
               ready for the single upsample matmul.

    pooled_ref: (1, C, sum_bb)    w_ref: (L*R, C)    m_ref: (L*R, sum_bb) 0/1
    invc_ref:   (L*R, 1) = 1/(N*bb_l)                qn_ref: (1, L*R, sum_bb)
    """
    p = pl.program_id(0)
    n = pl.program_id(1)

    @pl.when(jnp.logical_and(p == 0, n == 0))
    def _init():
        ssum_ref[...] = jnp.zeros_like(ssum_ref)
        ssq_ref[...] = jnp.zeros_like(ssq_ref)

    # One (L*R, C) x (C, sum_bb) MXU matmul covers every level's 1x1 conv.
    q = jnp.dot(w_ref[...], pooled_ref[0], preferred_element_type=jnp.float32)
    qm = q * m_ref[...]          # keep only each level's own pooled columns

    @pl.when(p == 0)
    def _accumulate_stats():
        ssum_ref[...] = ssum_ref[...] + qm.sum(axis=1, keepdims=True)
        ssq_ref[...] = ssq_ref[...] + (qm * qm).sum(axis=1, keepdims=True)

    @pl.when(p == 1)
    def _normalize():
        invc = invc_ref[...]
        mean = ssum_ref[...] * invc
        var = ssq_ref[...] * invc - mean * mean       # biased (train-mode BN)
        inv_std = jax.lax.rsqrt(var + _BN_EPS)
        qn_ref[0] = jnp.maximum((q - mean) * inv_std, 0.0) * m_ref[...]


def _make_upsample_kernel(c_in, lr):
    def upsample_kernel(x_ref, upT_ref, qn_ref, o_ref):
        """Bilinear upsample of every level + channel concat with the input.

        x_ref:   (1, C, T)          passthrough pixels (copied bit-exactly)
        upT_ref: (sum_bb, T)        bilinear weights (zero-padded past H*W)
        qn_ref:  (1, L*R, sum_bb)   block-structured normalized features
        o_ref:   (1, C + L*R, T)    concatenated output tile (lane-dense)
        """
        o_ref[0, 0:c_in, :] = x_ref[0].astype(o_ref.dtype)
        lvl = jnp.dot(qn_ref[0].astype(upT_ref.dtype), upT_ref[...],
                      preferred_element_type=jnp.float32)      # (L*R, T)
        o_ref[0, c_in:c_in + lr, :] = lvl.astype(o_ref.dtype)
    return upsample_kernel


# ---------------------------------------------------------------------------
# Forward: x (N, in_dim, H, W) -> (N, in_dim + len(bins)*reduction_dim, H, W)
# ---------------------------------------------------------------------------
def ppm_forward(x_nchw, conv_weights, bins, *, tile_cols_pool=None,
                tile_cols_up=None, matmul_dtype=jnp.bfloat16):
    """conv_weights: list of (reduction_dim, in_dim) 1x1-conv weights, one per
    bin (PyTorch (out, in) layout, no bias).  matmul_dtype sets the dtype of
    the static pool/upsample operators and of the MXU operands (default bf16,
    f32 accumulation); pass jnp.float32 for full precision."""
    N, C, H, W = x_nchw.shape
    bins = tuple(int(b) for b in bins)
    L = len(bins)
    R = int(conv_weights[0].shape[0])
    LR = L * R
    HW = H * W
    level_slices, sum_bb = _level_layout(bins)
    C_out = C + LR

    x_dt = x_nchw.dtype
    x_sz = jnp.dtype(x_dt).itemsize
    mm_dtype = jnp.dtype(matmul_dtype) if matmul_dtype is not None else jnp.dtype(x_dt)
    mm_sz = mm_dtype.itemsize

    vmem_limit = _vmem_limit_bytes()
    budget = (vmem_limit * 17) // 20     # ~85%: headroom for internal scratch

    Cb = _choose_channel_block(C, N)
    n_cb = C // Cb

    # ---- tile sizes (decoupled for the two tiled passes) -------------------
    if tile_cols_pool is None:
        T_pool = _pick_tile(HW, per_col_bytes=2 * (Cb * x_sz + sum_bb * mm_sz),
                            fixed_bytes=2 * Cb * sum_bb * 4,
                            budget_bytes=budget)
    else:
        T_pool = int(tile_cols_pool)
    if tile_cols_up is None:
        T_up = _pick_tile(HW,
                          per_col_bytes=2 * ((C + C_out) * x_sz + sum_bb * mm_sz),
                          fixed_bytes=2 * LR * sum_bb * 4,
                          budget_bytes=budget)
    else:
        T_up = int(tile_cols_up)
    for t in (T_pool, T_up):
        if t <= 0 or t % _LANE != 0:
            raise ValueError(f"pixel tiles must be positive multiples of {_LANE}, got {t}")

    n_tp = int(pl.cdiv(HW, T_pool))
    n_tu = int(pl.cdiv(HW, T_up))
    hw_pad_pool = n_tp * T_pool
    hw_pad_up = n_tu * T_up

    # ---- static operators (cached on (H, W, bins)), zero-padded to the grid -
    poolT_np, upT_np = _build_operators(H, W, bins)
    if hw_pad_pool != HW:
        poolT_np = np.pad(poolT_np, ((0, hw_pad_pool - HW), (0, 0)))
    if hw_pad_up != HW:
        upT_np = np.pad(upT_np, ((0, 0), (0, hw_pad_up - HW)))
    poolT = jnp.asarray(poolT_np, dtype=mm_dtype)                 # (HWp, sum_bb)
    upT = jnp.asarray(upT_np, dtype=mm_dtype)                     # (sum_bb, HWp)

    # ---- head-side statics: stacked conv weights, level mask, 1/counts -----
    w2 = jnp.concatenate([jnp.asarray(w, jnp.float32) for w in conv_weights],
                         axis=0)                                  # (L*R, C)
    m_np = np.zeros((LR, sum_bb), dtype=np.float32)
    invc_np = np.zeros((LR, 1), dtype=np.float32)
    for l, (off, bb) in enumerate(level_slices):
        m_np[l * R:(l + 1) * R, off:off + bb] = 1.0
        invc_np[l * R:(l + 1) * R, 0] = 1.0 / float(N * bb)
    m_mask = jnp.asarray(m_np)
    inv_cnt = jnp.asarray(invc_np)

    # Channels-first "rows": a pure reshape of NCHW -- no HBM transpose pass.
    x_chw = x_nchw.reshape(N, C, HW)

    # --- 1) adaptive average pooling of all bins, tiled over pixels ---------
    pooled = pl.pallas_call(
        _make_pool_kernel(HW, T_pool, hw_pad_pool != HW, mm_dtype),
        out_shape=jax.ShapeDtypeStruct((N, C, sum_bb), jnp.float32),
        grid=(N, n_cb, n_tp),
        in_specs=[
            pl.BlockSpec((1, Cb, T_pool), lambda n, c, t: (n, c, t)),
            pl.BlockSpec((T_pool, sum_bb), lambda n, c, t: (t, 0)),
        ],
        out_specs=pl.BlockSpec((1, Cb, sum_bb), lambda n, c, t: (n, c, 0)),
        compiler_params=pltpu.CompilerParams(
            dimension_semantics=("parallel", "parallel", "arbitrary"),
            vmem_limit_bytes=vmem_limit),
        cost_estimate=pl.CostEstimate(
            flops=2 * N * HW * C * sum_bb,
            transcendentals=0,
            bytes_accessed=N * HW * C * x_sz
                           + N * n_cb * hw_pad_pool * sum_bb * mm_sz
                           + N * C * sum_bb * 4),
    )(x_chw, poolT)

    # --- 2) 1x1 conv + BN(train, affine=False) + ReLU, two-phase over batch -
    qn_bd = pl.pallas_call(
        _head_kernel,
        out_shape=jax.ShapeDtypeStruct((N, LR, sum_bb), jnp.float32),
        grid=(2, N),
        in_specs=[
            pl.BlockSpec((1, C, sum_bb), lambda p, n: (n, 0, 0)),
            pl.BlockSpec((LR, C), lambda p, n: (0, 0)),
            pl.BlockSpec((LR, sum_bb), lambda p, n: (0, 0)),
            pl.BlockSpec((LR, 1), lambda p, n: (0, 0)),
        ],
        out_specs=pl.BlockSpec((1, LR, sum_bb), lambda p, n: (p * n, 0, 0)),
        scratch_shapes=[pltpu.VMEM((LR, 1), jnp.float32),
                        pltpu.VMEM((LR, 1), jnp.float32)],
        compiler_params=pltpu.CompilerParams(
            dimension_semantics=("arbitrary", "arbitrary"),
            vmem_limit_bytes=vmem_limit),
        cost_estimate=pl.CostEstimate(
            flops=4 * N * LR * C * sum_bb + 10 * N * LR * sum_bb,
            transcendentals=LR,
            bytes_accessed=(2 * N * C * sum_bb + LR * C + LR * sum_bb
                            + LR + N * LR * sum_bb) * 4),
    )(pooled, w2, m_mask, inv_cnt)

    # --- 3) bilinear upsample of every level + channel concat (one matmul) --
    y = pl.pallas_call(
        _make_upsample_kernel(C, LR),
        out_shape=jax.ShapeDtypeStruct((N, C_out, HW), x_dt),
        grid=(N, n_tu),
        in_specs=[
            pl.BlockSpec((1, C, T_up), lambda n, t: (n, 0, t)),
            pl.BlockSpec((sum_bb, T_up), lambda n, t: (0, t)),
            pl.BlockSpec((1, LR, sum_bb), lambda n, t: (n, 0, 0)),
        ],
        out_specs=pl.BlockSpec((1, C_out, T_up), lambda n, t: (n, 0, t)),
        compiler_params=pltpu.CompilerParams(
            dimension_semantics=("parallel", "parallel"),
            vmem_limit_bytes=vmem_limit),
        cost_estimate=pl.CostEstimate(
            flops=2 * N * hw_pad_up * LR * sum_bb,
            transcendentals=0,
            bytes_accessed=N * HW * C * x_sz + N * hw_pad_up * sum_bb * mm_sz
                           + N * LR * sum_bb * 4 + N * HW * C_out * x_sz),
    )(x_chw, upT, qn_bd)

    # Channels-first output -> NCHW is a pure reshape (no transpose pass).
    return y.reshape(N, C_out, H, W)


# ---------------------------------------------------------------------------
# Pure-JAX (XLA) reference with identical semantics, for validation.
# ---------------------------------------------------------------------------
def ppm_reference(x_nchw, conv_weights, bins):
    N, C, H, W = x_nchw.shape
    HW = H * W
    bins = tuple(int(b) for b in bins)
    level_slices, _ = _level_layout(bins)
    poolT_np, upT_np = _build_operators(H, W, bins)
    poolT = jnp.asarray(poolT_np)
    upT = jnp.asarray(upT_np)
    x_chw = x_nchw.reshape(N, C, HW).astype(jnp.float32)
    outs = [x_nchw]
    for (off, bb), w in zip(level_slices, conv_weights):
        pooled = jnp.einsum("ncs,sb->ncb", x_chw, poolT[:, off:off + bb])
        q = jnp.einsum("rc,ncb->nrb", w.astype(jnp.float32), pooled)
        m = q.mean(axis=(0, 2), keepdims=True)
        v = jnp.square(q - m).mean(axis=(0, 2), keepdims=True)
        qn = jnp.maximum((q - m) * jax.lax.rsqrt(v + _BN_EPS), 0.0)
        lvl = jnp.einsum("nrb,bs->nrs", qn, upT[off:off + bb, :])
        outs.append(lvl.reshape(N, -1, H, W).astype(x_nchw.dtype))
    return jnp.concatenate(outs, axis=1)


if __name__ == "__main__":
    bins = (1, 2, 3, 6)

    # --- config 1: batch=2, sublane-aligned channels (R = 8) ----------------
    N, in_dim, H, W = 2, 32, 16, 16
    reduction_dim = in_dim // len(bins)         # 8
    key = jax.random.PRNGKey(0)
    keys = jax.random.split(key, len(bins) + 1)
    x = jax.random.normal(keys[0], (N, in_dim, H, W), dtype=jnp.float32)
    conv_weights = [
        jax.random.normal(keys[i + 1], (reduction_dim, in_dim), dtype=jnp.float32) * 0.1
        for i in range(len(bins))
    ]
    expected_c = in_dim + len(bins) * reduction_dim
    ref = jax.block_until_ready(ppm_reference(x, conv_weights, bins))

    # f32 matmuls, default tile selection.
    out = jax.block_until_ready(
        ppm_forward(x, conv_weights, bins, matmul_dtype=jnp.float32))
    assert out.shape == (N, expected_c, H, W), out.shape
    assert bool(jnp.array_equal(out[:, :in_dim], x)), "passthrough not exact"
    max_err = float(jnp.max(jnp.abs(out - ref)))
    mean_err = float(jnp.mean(jnp.abs(out - ref)))
    assert max_err < 5e-2 and mean_err < 2e-3, (max_err, mean_err)

    # f32 matmuls, forced 128-wide tiles: multi-tile accumulation + pipeline.
    out_t = jax.block_until_ready(
        ppm_forward(x, conv_weights, bins, matmul_dtype=jnp.float32,
                    tile_cols_pool=128, tile_cols_up=128))
    max_err_t = float(jnp.max(jnp.abs(out_t - ref)))
    mean_err_t = float(jnp.mean(jnp.abs(out_t - ref)))
    assert max_err_t < 5e-2 and mean_err_t < 2e-3, (max_err_t, mean_err_t)

    # Default bf16-matmul path: loose check (bf16 quantization of operands).
    out_bf = jax.block_until_ready(ppm_forward(x, conv_weights, bins))
    assert out_bf.shape == (N, expected_c, H, W)
    assert bool(jnp.all(jnp.isfinite(out_bf)))
    assert bool(jnp.array_equal(out_bf[:, :in_dim], x)), "passthrough not exact"
    assert float(jnp.max(jnp.abs(out_bf - ref))) < 0.5

    # --- config 2: N=1, H*W=144 (no multiple-of-128 divisor) ----------------
    # Exercises the masked remainder tile, zero-padded operators, partial
    # output-block writes and the channel-block split used for v7x megacore.
    N2, H2, W2b = 1, 12, 12
    k2 = jax.random.split(jax.random.PRNGKey(1), 2)
    x2 = jax.random.normal(k2[0], (N2, in_dim, H2, W2b), dtype=jnp.float32)
    ref2 = jax.block_until_ready(ppm_reference(x2, conv_weights, bins))
    out2 = jax.block_until_ready(
        ppm_forward(x2, conv_weights, bins, matmul_dtype=jnp.float32))
    assert out2.shape == (N2, expected_c, H2, W2b), out2.shape
    assert bool(jnp.array_equal(out2[:, :in_dim], x2)), "passthrough not exact"
    max_err2 = float(jnp.max(jnp.abs(out2 - ref2)))
    mean_err2 = float(jnp.mean(jnp.abs(out2 - ref2)))
    assert max_err2 < 5e-2 and mean_err2 < 2e-3, (max_err2, mean_err2)

    # TODO(synk): BatchNorm modeled as affine=False train-mode batch stats
    # (exactly as the module defines it); eval-mode running stats not modeled.
    print("KERNEL_OK")
</pallas_src>

<mosaic_0001>
module attributes {stable_mosaic.version = 11 : i64} {
  func.func @pool_kernel(%arg0: i32, %arg1: i32, %arg2: i32, %arg3: memref<1x32x256xf32, #tpu.memory_space<vmem>>, %arg4: memref<256x50xf32, #tpu.memory_space<vmem>>, %arg5: memref<1x32x50xf32, #tpu.memory_space<vmem>>) attributes {dimension_semantics = [#tpu.dimension_semantics<parallel>, #tpu.dimension_semantics<parallel>, #tpu.dimension_semantics<arbitrary>], iteration_bounds = array<i64: 2, 1, 1>, scalar_prefetch = 0 : i64, scratch_operands = 0 : i64, tpu.core_type = #tpu.core_type<tc>, window_params = [{transform_indices = @transform_0, window_bounds = array<i64: 1, 32, 256>}, {transform_indices = @transform_1, window_bounds = array<i64: 256, 50>}, {transform_indices = @transform_2, window_bounds = array<i64: 1, 32, 50>}]} {
    %c0_i32 = arith.constant 0 : i32
    %0 = arith.cmpi eq, %arg2, %c0_i32 : i32
    %1 = arith.extui %0 : i1 to i32
    %c0_i32_0 = arith.constant 0 : i32
    %2 = arith.cmpi ne, %1, %c0_i32_0 : i32
    scf.if %2 {
      %cst_11 = arith.constant 0.000000e+00 : f32
      %13 = vector.broadcast %cst_11 : f32 to vector<1x32x50xf32>
      %c0_12 = arith.constant 0 : index
      %c0_13 = arith.constant 0 : index
      %c0_14 = arith.constant 0 : index
      %14 = vector.load %arg5[%c0_12, %c0_13, %c0_14] : memref<1x32x50xf32, #tpu.memory_space<vmem>>, vector<1x32x50xf32>
      tpu.vector_store %arg5[%c0_12, %c0_13, %c0_14], %13 {strides = array<i32>} : memref<1x32x50xf32, #tpu.memory_space<vmem>>, vector<1x32x50xf32>,
    } else {
    }
    %c0 = arith.constant 0 : index
    %c0_1 = arith.constant 0 : index
    %c0_2 = arith.constant 0 : index
    %3 = vector.load %arg3[%c0, %c0_1, %c0_2] : memref<1x32x256xf32, #tpu.memory_space<vmem>>, vector<1x32x256xf32>
    %4 = vector.shape_cast %3 : vector<1x32x256xf32> to vector<32x256xf32>
    %c0_3 = arith.constant 0 : index
    %c0_4 = arith.constant 0 : index
    %c0_5 = arith.constant 0 : index
    %5 = vector.load %arg5[%c0_3, %c0_4, %c0_5] : memref<1x32x50xf32, #tpu.memory_space<vmem>>, vector<1x32x50xf32>
    %6 = vector.shape_cast %5 : vector<1x32x50xf32> to vector<32x50xf32>
    %c0_6 = arith.constant 0 : index
    %c0_7 = arith.constant 0 : index
    %7 = vector.load %arg4[%c0_6, %c0_7] : memref<256x50xf32, #tpu.memory_space<vmem>>, vector<256x50xf32>
    %cst = arith.constant dense<0.000000e+00> : vector<32x50xf32>
    %8 = tpu.matmul %4, %7, %cst {dimension_numbers = #tpu.dot_dimension_numbers<[1], [0], [0], [1], [0, 0, 1, 1], [], []>} : vector<32x256xf32>, vector<256x50xf32>, vector<32x50xf32> -> vector<32x50xf32>
    %9 = arith.addf %6, %8 : vector<32x50xf32>
    %c0_8 = arith.constant 0 : index
    %c0_9 = arith.constant 0 : index
    %c0_10 = arith.constant 0 : index
    %10 = vector.load %arg5[%c0_8, %c0_9, %c0_10] : memref<1x32x50xf32, #tpu.memory_space<vmem>>, vector<1x32x50xf32>
    %11 = vector.shape_cast %10 : vector<1x32x50xf32> to vector<32x50xf32>
    %12 = vector.shape_cast %9 : vector<32x50xf32> to vector<1x32x50xf32>
    tpu.vector_store %arg5[%c0_8, %c0_9, %c0_10], %12 {strides = array<i32>} : memref<1x32x50xf32, #tpu.memory_space<vmem>>, vector<1x32x50xf32>,
    return
  }
  func.func @transform_0(%arg0: i32, %arg1: i32, %arg2: i32) -> (i32, i32, i32) {
    %c0_i32 = arith.constant 0 : i32
    return %arg0, %arg1, %arg2 : i32, i32, i32
  }
  func.func @transform_1(%arg0: i32, %arg1: i32, %arg2: i32) -> (i32, i32) {
    %c0_i32 = arith.constant 0 : i32
    %c0_i32_0 = arith.constant 0 : i32
    return %arg2, %c0_i32 : i32, i32
  }
  func.func @transform_2(%arg0: i32, %arg1: i32, %arg2: i32) -> (i32, i32, i32) {
    %c0_i32 = arith.constant 0 : i32
    %c0_i32_0 = arith.constant 0 : i32
    return %arg0, %arg1, %c0_i32 : i32, i32, i32
  }
}

</mosaic_0001>

<bundles_post_ra>
// kernel: tpu_custom_call.1
= control target key start
LH: loop header
LB: loop body
LE: loop exit
PB: predicated region body
PF: predicated region fallthrough
CT: control target
= control target key end

     0   :  { %7 = vsyncpa [#allocation3], 0  ;;  %s1000_s0 = inlined_call_operand.vmem [shape: f32[2,32,256], index: 0, kind: input, shape index: {}]   ;;  %s1001_s1 = inlined_call_operand.vmem [shape: f32[256,50], index: 1, kind: input, shape index: {}]   ;;  %s1002_s2 = inlined_call_operand.hbm [shape: f32[2,32,50], index: 2, kind: output, shape index: {}]  }
   0x1   :  { %9 = vsyncpa [#allocation3 + $0x1], 0  ;;  %s752_s9 = smov 0   ;;  %s754_s10 = smov 0  }
   0x2   :  { %s756_s11 = smov 0   ;;  %s758_s12 = smov 0  }
   0x3   :  { %s760_s13 = smov 0   ;;  %s762_s14 = smov 0  }
   0x4 LB: > { %s487_s15 = sadd.s32 4294967295, %s731_s14   ;;  %s488_s16 = sadd.s32 4294967294, %s731_s14   ;;  %s731_s14 = sphi %s762_s14, %s15_s14   ;;  %s727_s13 = sphi %s760_s13, %s1009_s13   ;;  %s723_s12 = sphi %s758_s12, %s1008_s12   ;;  %s719_s11 = sphi %s756_s11, %s1007_s11   ;;  %s715_s10 = sphi %s754_s10, %s1006_s10   ;;  %s711_s9 = sphi %s752_s9, %s1005_s9  }
   0x5   : > { %s34_s17 = sadd.s32 1, %s727_s13  ;;  %s99_s18 = sadd.s32 1, %s719_s11 }
   0x6   : > { %p36_p0 = scmp.ge.s32.totalorder %s34_s17, 2  ;;  %p109_p1 = scmp.ne.s32.totalorder %s719_s11, %s715_s10 }
   0x7   : > { %p110_p2 = scmp.eq.s32.totalorder %s487_s15, 1  ;;  %p115_p3 = scmp.ne.s32.totalorder %s715_s10, %s711_s9 }
   0x8   : > { %s1011_s17 = smov (%p36_p0, %s34_s17), 0  ;;  %p116_p5 = scmp.eq.s32.totalorder %s488_s16, 1 }
   0x9   : > { %p792_p4 = por %p110_p2, %p109_p1  ;;  %s94_s20 = ssub.s32 %s727_s13, %s1011_s17 }
   0xa   : > { %p492_p6 = scmp.ge.s32.totalorder %s731_s14, 1  ;;  %p97_p7 = scmp.eq.s32.totalorder %s94_s20, 0 }
   0xb   : > { %p799_p8 = por %p116_p5, %p115_p3  ;;  %p162_p9 = scmp.lt.s32.totalorder %s731_s14, 3 }
   0xc   : > { %s805_s22 = scalar_select %p97_p7, %s719_s11, %s99_s18  }
   0xd   : > { %p163_p10 = pnand %p492_p6, %p162_p9 }
   0xe   : > { %v258_v0 = vld [vmem:[%s1001_s1 + $0x80] sm:$0xff] (!%p163_p10)  ;;  %v259_v1 = vld [vmem:[%s1001_s1 + $0x88] sm:$0xff] (!%p163_p10)  ;;  %p200_p11 = scmp.lt.s32.totalorder (!%p163_p10), %s723_s12, 1  ;;  %v260_v5 = vld [vmem:[%s1001_s1 + $0x90] sm:$0xff] (!%p163_p10)  ;;  %s195_s20 = sand.u32 (!%p163_p10), 1, %s715_s10   ;;  %vm225_vm0 = vcmask (!%p163_p10), 408576  }
   0xf   : > { %166 = sbr.rel (%p163_p10) target bundleno = 285 (0x11d), region = 28  ;;  %v242_v2 = vld [vmem:[%s1001_s1] sm:$0xff] (!%p163_p10)  ;;  %v547_v3 = vpack.c.bf16 (!%p163_p10), %v259_v1, %v258_v0  ;;  %v243_v4 = vld [vmem:[%s1001_s1 + $0x8] sm:$0xff] (!%p163_p10)  ;;  %v261_v6 = vld [vmem:[%s1001_s1 + $0x98] sm:$0xff] (!%p163_p10)  ;;  %v733_v56 = vmov (!%p163_p10), 0.0   ;;  %s734_s30 = smov (!%p163_p10), [#allocation2]  }
  0x10   : > { %v549_v7 = vpack.c.bf16 (!%p163_p10), %v243_v4, %v242_v2  ;;  %v551_v8 = vpack.c.bf16 (!%p163_p10), %v261_v6, %v260_v5  ;;  %v244_v9 = vld [vmem:[%s1001_s1 + $0x10] sm:$0xff] (!%p163_p10)  ;;  %v245_v10 = vld [vmem:[%s1001_s1 + $0x18] sm:$0xff] (!%p163_p10)  ;;  %v262_v11 = vld [vmem:[%s1001_s1 + $0xa0] sm:$0xff] (!%p163_p10)  ;;  %s657_s3 = sshll.u32 (!%p163_p10), %s734_s30, 4  ;;  %s658_s3 = int_to_ptr.vmem [resolvable:$false] %s657_s3 }
  0x11   : > { %548 = vmatprep.subr.bf16.mxu0 (!%p163_p10), %v547_v3  ;;  %579 = vmatprep.subr.bf16.mxu1 (!%p163_p10), %v547_v3  ;;  %v263_v12 = vld [vmem:[%s1001_s1 + $0xa8] sm:$0xff] (!%p163_p10)  ;;  %v553_v13 = vpack.c.bf16 (!%p163_p10), %v245_v10, %v244_v9  ;;  %v246_v15 = vld [vmem:[%s1001_s1 + $0x20] sm:$0xff] (!%p163_p10)  ;;  %v264_v17 = vld [vmem:[%s1001_s1 + $0xb0] sm:$0xff] (!%p163_p10)  ;;  %s659_s4 = scalar_lea.vmem (!%p163_p10), %s658_s3, 1024 }
  0x12   : > { %550 = vmatpush3.bf16.msra.mxu0 (!%p163_p10), %v549_v7  ;;  %587 = vmatpush3.bf16.msra.mxu1 (!%p163_p10), %v549_v7  ;;  %v555_v14 = vpack.c.bf16 (!%p163_p10), %v263_v12, %v262_v11  ;;  %v247_v16 = vld [vmem:[%s1001_s1 + $0x28] sm:$0xff] (!%p163_p10)  ;;  %v265_v18 = vld [vmem:[%s1001_s1 + $0xb8] sm:$0xff] (!%p163_p10)  ;;  %v248_v21 = vld [vmem:[%s1001_s1 + $0x30] sm:$0xff] (!%p163_p10) }
  0x13   : > { %552 = vmatprep.subr.bf16.mxu0 (!%p163_p10), %v551_v8  ;;  %580 = vmatprep.subr.bf16.mxu1 (!%p163_p10), %v551_v8  ;;  %v557_v19 = vpack.c.bf16 (!%p163_p10), %v247_v16, %v246_v15  ;;  %v559_v20 = vpack.c.bf16 (!%p163_p10), %v265_v18, %v264_v17  ;;  %v249_v22 = vld [vmem:[%s1001_s1 + $0x38] sm:$0xff] (!%p163_p10)  ;;  %v266_v23 = vld [vmem:[%s1001_s1 + $0xc0] sm:$0xff] (!%p163_p10)  ;;  %v267_v24 = vld [vmem:[%s1001_s1 + $0xc8] sm:$0xff] (!%p163_p10) }
  0x14   : > { %v561_v27 = vpack.c.bf16 (!%p163_p10), %v249_v22, %v248_v21  ;;  %v563_v28 = vpack.c.bf16 (!%p163_p10), %v267_v24, %v266_v23  ;;  %v250_v29 = vld [vmem:[%s1001_s1 + $0x40] sm:$0xff] (!%p163_p10)  ;;  %v251_v30 = vld [vmem:[%s1001_s1 + $0x48] sm:$0xff] (!%p163_p10)  ;;  %v268_v31 = vld [vmem:[%s1001_s1 + $0xd0] sm:$0xff] (!%p163_p10) }
  0x15   : > { %v269_v32 = vld [vmem:[%s1001_s1 + $0xd8] sm:$0xff] (!%p163_p10)  ;;  %v565_v33 = vpack.c.bf16 (!%p163_p10), %v251_v30, %v250_v29  ;;  %v252_v35 = vld [vmem:[%s1001_s1 + $0x50] sm:$0xff] (!%p163_p10)  ;;  %v270_v37 = vld [vmem:[%s1001_s1 + $0xe0] sm:$0xff] (!%p163_p10) }
  0x16   : > { %s201_s23 = scalar_select %p200_p11, %s723_s12, 1  ;;  %554 = vmatpush3.bf16.msra.mxu0 %v553_v13  ;;  %588 = vmatpush3.bf16.msra.mxu1 %v553_v13  ;;  %v567_v34 = vpack.c.bf16 %v269_v32, %v268_v31  ;;  %v253_v36 = vld [vmem:[%s1001_s1 + $0x58] sm:$0xff]  ;;  %v271_v38 = vld [vmem:[%s1001_s1 + $0xe8] sm:$0xff]  ;;  %v254_v41 = vld [vmem:[%s1001_s1 + $0x60] sm:$0xff] }
  0x17   : > { %556 = vmatprep.subr.bf16.mxu0 %v555_v14  ;;  %581 = vmatprep.subr.bf16.mxu1 %v555_v14  ;;  %v569_v39 = vpack.c.bf16 %v253_v36, %v252_v35  ;;  %v571_v40 = vpack.c.bf16 %v271_v38, %v270_v37  ;;  %v255_v42 = vld [vmem:[%s1001_s1 + $0x68] sm:$0xff]  ;;  %v272_v43 = vld [vmem:[%s1001_s1 + $0xf0] sm:$0xff]  ;;  %v273_v44 = vld [vmem:[%s1001_s1 + $0xf8] sm:$0xff] }
  0x18   : > { %s501_s26 = sshll.u32 %s201_s23, 6  ;;  %v573_v45 = vpack.c.bf16 %v255_v42, %v254_v41  ;;  %v575_v46 = vpack.c.bf16 %v273_v44, %v272_v43  ;;  %v256_v47 = vld [vmem:[%s1001_s1 + $0x70] sm:$0xff]  ;;  %v257_v48 = vld [vmem:[%s1001_s1 + $0x78] sm:$0xff]  ;;  %s493_s23 = sshll.u32 %s195_s20, 5 }
  0x19   : > { %s854_s15 = scalar_lea.vmem %s1000_s0, %s501_s26  ;;  %v577_v49 = vpack.c.bf16 %v257_v48, %v256_v47  ;;  %s921_s24 = scalar_lea.vmem [#allocation2], %s493_s23 }
  0x1a   : > { %v231_v25 = vld [vmem:[%s854_s15 + $0x8] sm:$0xff]  ;;  %558 = vmatpush3.bf16.msra.mxu0 %v557_v19  ;;  %589 = vmatpush3.bf16.msra.mxu1 %v557_v19  ;;  %v230_v50 = vld [vmem:[%s854_s15] sm:$0xff]  ;;  %v233_v52 = vld [vmem:[%s854_s15 + $0x18] sm:$0xff]  ;;  %226 = vst.msk [vmem:[%s921_s24] sm:$0xff] %vm225_vm0, %v733_v56  ;;  %s384_s25 = sshll.u32 %s921_s24, 4  ;;  %s946_s25 = int_to_ptr.vmem [resolvable:$true] %s384_s25 }
  0x1b   : > { %338 = vmatprep.mubr.f32.mxu0 %v231_v25  ;;  %v235_v26 = vld [vmem:[%s854_s15 + $0x28] sm:$0xff]  ;;  %560 = vmatprep.subr.bf16.mxu0 %v559_v20  ;;  %v234_v51 = vld [vmem:[%s854_s15 + $0x20] sm:$0xff]  ;;  %v237_v53 = vld [vmem:[%s854_s15 + $0x38] sm:$0xff]  ;;  %227 = vst.msk [vmem:[%s921_s24 + $0x8] sm:$0xff] %vm225_vm0, %v733_v56  ;;  %s653_s29 = scalar_lea.vmem %s946_s25, 512  ;;  %p660_p1 = scmp.lt.s32.totalorder %s946_s25, %s658_s3 }
  0x1c   : > { %582 = vmatprep.subr.bf16.mxu1 %v559_v20  ;;  %348 = vmatprep.mubr.f32.mxu1 %v235_v26  ;;  %v232_v54 = vld [vmem:[%s854_s15 + $0x10] sm:$0xff]  ;;  %228 = vst.msk [vmem:[%s921_s24 + $0x10] sm:$0xff] %vm225_vm0, %v733_v56  ;;  %229 = vst.msk [vmem:[%s921_s24 + $0x18] sm:$0xff] %vm225_vm0, %v733_v56  ;;  %p654_p12 = scmp.ne.s32.totalorder %s946_s25, %s653_s29  ;;  %p661_p2 = scmp.lt.s32.totalorder %s659_s4, %s653_s29 }
  0x1d   : > { %v236_v55 = vld [vmem:[%s854_s15 + $0x30] sm:$0xff]  ;;  %s502_s15 = sshll.u32 %s723_s12, 9  ;;  %s954_s12 = scalar_lea.sflag [#allocation3], %s195_s20 }
  0x1e   : > { %562 = vmatpush3.bf16.msra.mxu0 %v561_v27  ;;  %590 = vmatpush3.bf16.msra.mxu1 %v561_v27  ;;  %s944_s28 = scalar_lea.hbm %s1002_s2, %s502_s15  ;;  %p655_p13 = pnand %p654_p12, %p792_p4 }
  0x1f   : > { %564 = vmatprep.subr.bf16.mxu0 %v563_v28  ;;  %583 = vmatprep.subr.bf16.mxu1 %v563_v28  ;;  %p662_p3 = por %p661_p2, %p660_p1 }
  0x20   : > { %p656_p0 = pneg %p655_p13 }
  0x21   : > { %v238_v59 = vld [vmem:[%s921_s24] sm:$0xff] }
  0x22   : > { %566 = vmatpush3.bf16.msra.mxu0 %v565_v33  ;;  %591 = vmatpush3.bf16.msra.mxu1 %v565_v33  ;;  %v239_v5 = vld [vmem:[%s921_s24 + $0x8] sm:$0xff]  ;;  %p663_p5 = pnand %p662_p3, %p656_p0 }
  0x23   : > { %568 = vmatprep.subr.bf16.mxu0 %v567_v34  ;;  %584 = vmatprep.subr.bf16.mxu1 %v567_v34  ;;  %v240_v61 = vld [vmem:[%s921_s24 + $0x10] sm:$0xff]  ;;  %v241_v7 = vld [vmem:[%s921_s24 + $0x18] sm:$0xff] }
  0x26   : > { %570 = vmatpush3.bf16.msra.mxu0 %v569_v39  ;;  %592 = vmatpush3.bf16.msra.mxu1 %v569_v39 }
  0x27   : > { %572 = vmatprep.subr.bf16.mxu0 %v571_v40  ;;  %585 = vmatprep.subr.bf16.mxu1 %v571_v40 }
  0x2a   : > { %574 = vmatpush3.bf16.msra.mxu0 %v573_v45  ;;  %593 = vmatpush3.bf16.msra.mxu1 %v573_v45 }
  0x2b   : > { %576 = vmatprep.subr.bf16.mxu0 %v575_v46  ;;  %586 = vmatprep.subr.bf16.mxu1 %v575_v46 }
  0x2e   : > { %578 = vmatpush3.bf16.msra.mxu0 %v577_v49  ;;  %594 = vmatpush3.bf16.msra.mxu1 %v577_v49 }
  0x31   : > { %339 = vmatmul.mubr.f32.vlgmr.msra.gmra.mrb[0].mxu0 %v230_v50  ;;  %349 = vmatmul.mubr.f32.vlgmr.msra.gmra.mrb[0].mxu1 %v234_v51 }
  0x32   : > { %343 = vmatprep.mubr.f32.mxu0 %v233_v52  ;;  %353 = vmatprep.mubr.f32.mxu1 %v237_v53 }
  0x35   : > { %344 = vmatmul.mubr.f32.gmra.mrb[2].mxu0 %v232_v54  ;;  %354 = vmatmul.mubr.f32.gmra.mrb[2].mxu1 %v236_v55 }
 0x104   : > { %v535_v57 = vpop.f32.mrb[0].mxu0  ;;  %v541_v58 = vpop.f32.mrb[0].mxu1 }
 0x105   : > { %v536_v60 = vpop.f32.mrb[1].mxu0  ;;  %v542_v62 = vpop.f32.mrb[1].mxu1 }
 0x106   : > { %v537_v63 = vadd.f32 %v536_v60, %v535_v57  ;;  %v543_v0 = vadd.f32 %v542_v62, %v541_v58 }
 0x108   : > { %v359_v1 = vadd.f32 %v537_v63, %v238_v59  ;;  %v361_v2 = vadd.f32 %v543_v0, %v240_v61  ;;  %v538_v3 = vpop.f32.mrb[2].mxu0  ;;  %v544_v4 = vpop.f32.mrb[2].mxu1 }
 0x109   : > { %v539_v6 = vpop.f32.mrb[3].mxu0  ;;  %v545_v8 = vpop.f32.mrb[3].mxu1 }
 0x10a   : > { %364 = vst.msk [vmem:[%s921_s24] sm:$0xff] %vm225_vm0, %v359_v1  ;;  %366 = vst.msk [vmem:[%s921_s24 + $0x10] sm:$0xff] %vm225_vm0, %v361_v2  ;;  %v540_v9 = vadd.f32 %v539_v6, %v538_v3  ;;  %v546_v10 = vadd.f32 %v545_v8, %v544_v4 }
 0x10c   : > { %v360_v11 = vadd.f32 %v540_v9, %v239_v5  ;;  %v362_v12 = vadd.f32 %v546_v10, %v241_v7 }
 0x10e   : > { %365 = vst.msk [vmem:[%s921_s24 + $0x8] sm:$0xff] %vm225_vm0, %v360_v11  ;;  %367 = vst.msk [vmem:[%s921_s24 + $0x18] sm:$0xff] %vm225_vm0, %v362_v12 }
 0x10f   : > { %666 = shalt.err (!%p663_p5)
}
 0x110   : > { %s667_s5 = scalar_lea.hbm %s944_s28, 512  ;;  %s671_s8 = scalar_lea.hbm %s1002_s2, 1024 }
 0x111   : > { %p668_p6 = scmp.ne.s32.totalorder %s944_s28, %s667_s5  ;;  %p672_p10 = scmp.lt.u32.totalorder %s944_s28, %s1002_s2 }
 0x112   : > { %p673_p11 = scmp.lt.u32.totalorder %s671_s8, %s667_s5  ;;  %p675_p13 = scmp.lt.u32.totalorder %s667_s5, %s944_s28 }
 0x113   : > { %p669_p7 = pnand %p668_p6, %p792_p4 }
 0x114   : > { %p674_p12 = por %p673_p11, %p672_p10 }
 0x115   : > { %p670_p9 = pneg %p669_p7 }
 0x116   : > { %p676_p0 = por %p675_p13, %p674_p12 }
 0x118   : > { %p677_p1 = pnand %p676_p0, %p670_p9 }
 0x11a   : > { %680 = shalt.err (!%p677_p1)
}
 0x11b   : > { %s735_s20 = smov 128   ;;  %s736_s23 = smov 8  }
 0x11c   : > { %595 = dma.vmem_to_hbm [thread:$0]  (%p792_p4), %s946_s25, 512, %s944_s28, %s954_s12, %s735_s20, %s735_s20, %s736_s23  }
 0x11d PF: > { %p601_p2 = scmp.ge.s32.totalorder %s731_s14, 2  ;;  %s399_s24 = sand.u32 1, %s711_s9  }
 0x11e   : > { %s400_s15 = scalar_lea.sflag [#allocation3], %s399_s24 }
 0x11f   : > { %p598_p3 = pnand %p601_p2, %p799_p8 }
 0x121   : > { %706 = dma.done.wait (!%p598_p3), %s400_s15, 512  }
 0x122   : > { %708 = vsyncadd (!%p598_p3), %s400_s15, 4294966784  ;;  %s15_s14 = sadd.s32 1, %s731_s14   ;;  %s1005_s9 = smov %s715_s10 }
 0x123   : > { %p12_p5 = scmp.ge.s32.totalorder %s15_s14, 4   ;;  %s1006_s10 = smov %s719_s11 }
 0x124   : > { %s1007_s11 = smov %s805_s22  ;;  %s1008_s12 = smov %s727_s13 }
 0x125   : > { %s1009_s13 = smov %s1011_s17  ;;  %14 = sbr.rel (!%p12_p5) target bundleno = 4 (0x4), region = 70 }
 0x12c   :  { %405 = vsyncpa [#allocation3], 1 }
 0x12d   :  { %407 = vsyncpa [#allocation3 + $0x1], 1 }

</bundles_post_ra>
